<compile_context>
chip_gen: v5e
topology: v5e:2x2
jax: 0.10.0
libtpu: 0.0.40
codegen_flags: <defaults>
</compile_context>

<pallas_src>
import functools

import jax
import jax.numpy as jnp
from jax.experimental import pallas as pl
from jax.experimental.pallas import tpu as pltpu

_LOG2 = 0.6931471805599453  # softplus(0)
_SUBLANE = 8


def _ssp(x):
    # shifted softplus: softplus(x) - softplus(0); numerically stable.
    # (logaddexp lowers to exp + log1p: 2 EUP ops per element.)
    return jnp.logaddexp(x, 0.0) - _LOG2


def _force_mlp_kernel(num_hidden_layers, *refs):
    """Fused MLP hot path.

    refs = (x_ref, w_0, b_0, ..., w_{L-1}, b_{L-1}, w_out, b_out, out_ref)
    num_hidden_layers = number of (Linear + SSP) layers before the output Linear.
    """
    x_ref = refs[0]
    out_ref = refs[-1]
    param_refs = refs[1:-1]

    # f32 tile from HBM; bf16 re-pack is vreg-local (MXU wants bf16 operands).
    h = x_ref[...].astype(jnp.bfloat16)
    for layer in range(num_hidden_layers):
        w_ref = param_refs[2 * layer]
        b_ref = param_refs[2 * layer + 1]
        acc = jnp.dot(h, w_ref[...], preferred_element_type=jnp.float32)  # MXU, f32 acc
        # bias add + SSP in f32 (VPU/EUP); re-pack to bf16 only as next MXU input
        h = _ssp(acc + b_ref[...]).astype(jnp.bfloat16)
    w_out_ref = param_refs[2 * num_hidden_layers]
    b_out_ref = param_refs[2 * num_hidden_layers + 1]
    out = jnp.dot(h, w_out_ref[...], preferred_element_type=jnp.float32) + b_out_ref[...]
    out_ref[...] = out.astype(out_ref.dtype)  # f32 (tile_m, output_size)


def _mlp_pallas(node_features, weights, biases, *, tile_m=None):
    """Runs the ForceHead MLP on (n_atoms, latent_dim) node features.

    weights: list of arrays, each (in_dim, out_dim)   [transpose of torch Linear.weight]
    biases:  list of arrays, each (out_dim,)
    Returns f32 predictions of shape (n_atoms, output_size).
    """
    n_atoms, latent_dim = node_features.shape
    out_dim = weights[-1].shape[1]
    num_hidden = len(weights) - 1

    # ---- row tiling: big tiles amortize the ~0.35 us/step overhead, but keep
    #      >= 4 grid steps so v7x's two TensorCores each see >= 2 pipelined
    #      steps along the "parallel" atoms axis (v5e/v6e just get pipelining).
    if tile_m is None:
        tile_m = 2048
        min_steps = 4
        while tile_m > _SUBLANE and pl.cdiv(n_atoms, tile_m) < min_steps:
            tile_m //= 2
    tile_m = max(_SUBLANE, -(-tile_m // _SUBLANE) * _SUBLANE)  # multiple of 8
    grid_m = pl.cdiv(n_atoms, tile_m)

    # ---- inputs at natural shapes: no pad / cast passes over the activations.
    operands = [node_features]
    in_specs = [pl.BlockSpec((tile_m, latent_dim), lambda i: (i, 0))]
    for w, b in zip(weights, biases):
        wb = w.astype(jnp.bfloat16)                 # MXU operand (tiny)
        bb = b.reshape(1, -1).astype(jnp.float32)   # f32 bias row for VPU add
        in_specs.append(pl.BlockSpec(wb.shape, lambda i: (0, 0)))
        in_specs.append(pl.BlockSpec(bb.shape, lambda i: (0, 0)))
        operands.append(wb)
        operands.append(bb)

    # Unpadded output: block last dim == full array dim (legal); HBM-side DMA
    # is a contiguous 12 B/row write, only the VMEM-side vst is masked and the
    # kernel is DMA-bound, not store-slot-bound, at this arithmetic intensity.
    out_spec = pl.BlockSpec((tile_m, out_dim), lambda i: (i, 0))

    # ---- advisory cost estimate for XLA's scheduler
    flops = sum(2 * n_atoms * w.shape[0] * w.shape[1] for w in weights)
    # SSP = exp + log1p -> 2 transcendentals per hidden element
    transcendentals = sum(2 * n_atoms * w.shape[1] for w in weights[:-1])
    bytes_accessed = (
        node_features.size * 4                                # f32 activations in
        + n_atoms * out_dim * 4                               # f32 logits out
        + sum(w.size * 2 + w.shape[1] * 4 for w in weights)   # params
    )
    cost = pl.CostEstimate(
        flops=flops, transcendentals=transcendentals, bytes_accessed=bytes_accessed
    )

    kernel = functools.partial(_force_mlp_kernel, num_hidden)
    return pl.pallas_call(
        kernel,
        out_shape=jax.ShapeDtypeStruct((n_atoms, out_dim), jnp.float32),
        grid=(grid_m,),
        in_specs=in_specs,
        out_specs=out_spec,
        compiler_params=pltpu.CompilerParams(dimension_semantics=("parallel",)),
        cost_estimate=cost,
    )(*operands)


def _remove_per_graph_mean(pred, n_node):
    """Subtract each graph's mean predicted force (removes the net force).

    NOTE: requires sum(n_node) == pred.shape[0]; jnp.repeat with
    total_repeat_length would otherwise silently misassign trailing atoms.
    """
    if n_node is None:
        n_node = jnp.array([pred.shape[0]], dtype=jnp.int32)
    num_graphs = n_node.shape[0]
    seg = jnp.repeat(
        jnp.arange(num_graphs, dtype=jnp.int32), n_node,
        total_repeat_length=pred.shape[0],
    )
    sums = jax.ops.segment_sum(pred, seg, num_segments=num_graphs)
    means = sums / jnp.maximum(n_node, 1).astype(pred.dtype)[:, None]
    return pred - means[seg]


def force_head_forward(node_features, weights, biases, *, n_node=None,
                       remove_mean=True, detach_node_features=False, tile_m=None):
    """ForceHead.forward: MLP + per-graph net-force removal (f32 output)."""
    if detach_node_features:
        node_features = jax.lax.stop_gradient(node_features)
    pred = _mlp_pallas(node_features, weights, biases, tile_m=tile_m)
    if remove_mean:
        pred = _remove_per_graph_mean(pred, n_node)
    # TODO(synk): remove_torque_for_nonpbc_systems needs atom positions / pbc flags
    # from the AtomGraphs batch; not implemented here.
    # TODO(synk): ScalarNormalizer.inverse (predict) and loss() are outside forward().
    return pred


def _init_params(key, latent_dim, mlp_hidden_dim, num_mlp_layers, output_size):
    """Deterministic synthetic parameter init (PyTorch Linear-style uniform)."""
    sizes = [latent_dim] + [mlp_hidden_dim] * num_mlp_layers + [output_size]
    weights, biases = [], []
    for i in range(len(sizes) - 1):
        fan_in, fan_out = sizes[i], sizes[i + 1]
        key, kw, kb = jax.random.split(key, 3)
        bound = 1.0 / jnp.sqrt(fan_in)
        # stored as (in, out): transpose of torch.nn.Linear.weight
        weights.append(
            jax.random.uniform(kw, (fan_in, fan_out), jnp.float32, -bound, bound)
        )
        biases.append(
            jax.random.uniform(kb, (fan_out,), jnp.float32, -bound, bound)
        )
    return weights, biases


def _reference_forward(x, weights, biases):
    """Pure-JAX reference mirroring the kernel's bf16-operand / f32-accumulate numerics."""
    h = x.astype(jnp.bfloat16)
    for w, b in zip(weights[:-1], biases[:-1]):
        acc = jnp.dot(h.astype(jnp.float32),
                      w.astype(jnp.bfloat16).astype(jnp.float32))
        h = _ssp(acc + b).astype(jnp.bfloat16)
    acc = jnp.dot(h.astype(jnp.float32),
                  weights[-1].astype(jnp.bfloat16).astype(jnp.float32))
    return acc + biases[-1]


if __name__ == "__main__":
    # Module config (small, consistent with ForceHead.__init__)
    latent_dim = 32
    mlp_hidden_dim = 32
    num_mlp_layers = 2
    output_size = 3
    n_atoms = 20           # deliberately not a multiple of the tile: exercises the ragged tail

    key = jax.random.PRNGKey(0)
    key, kx = jax.random.split(key)
    node_features = jax.random.normal(kx, (n_atoms, latent_dim), jnp.float32)
    weights, biases = _init_params(
        key, latent_dim, mlp_hidden_dim, num_mlp_layers, output_size
    )
    n_node = jnp.array([n_atoms], dtype=jnp.int32)  # single graph in the batch

    pred = force_head_forward(node_features, weights, biases, n_node=n_node)
    pred = jax.block_until_ready(pred)

    ref = _reference_forward(node_features, weights, biases)
    ref = ref - ref.mean(axis=0, keepdims=True)  # single-graph remove_mean
    assert pred.shape == (n_atoms, output_size)
    assert pred.dtype == jnp.float32
    assert jnp.allclose(pred, ref, atol=2e-3, rtol=2e-3)

    print("KERNEL_OK")
</pallas_src>

<mosaic_0001>
module attributes {stable_mosaic.version = 11 : i64} {
  func.func @_force_mlp_kernel(%arg0: i32, %arg1: memref<8x32xf32, #tpu.memory_space<vmem>>, %arg2: memref<32x32xbf16, #tpu.memory_space<vmem>>, %arg3: memref<1x32xf32, #tpu.memory_space<vmem>>, %arg4: memref<32x32xbf16, #tpu.memory_space<vmem>>, %arg5: memref<1x32xf32, #tpu.memory_space<vmem>>, %arg6: memref<32x3xbf16, #tpu.memory_space<vmem>>, %arg7: memref<1x3xf32, #tpu.memory_space<vmem>>, %arg8: memref<8x3xf32, #tpu.memory_space<vmem>>) attributes {dimension_semantics = [#tpu.dimension_semantics<parallel>], iteration_bounds = array<i64: 3>, scalar_prefetch = 0 : i64, scratch_operands = 0 : i64, tpu.core_type = #tpu.core_type<tc>, window_params = [{transform_indices = @transform_0, window_bounds = array<i64: 8, 32>}, {pipeline_mode = #tpu.pipeline_mode<synchronous>, transform_indices = @transform_1, window_bounds = array<i64: 32, 32>}, {pipeline_mode = #tpu.pipeline_mode<synchronous>, transform_indices = @transform_2, window_bounds = array<i64: 1, 32>}, {pipeline_mode = #tpu.pipeline_mode<synchronous>, transform_indices = @transform_3, window_bounds = array<i64: 32, 32>}, {pipeline_mode = #tpu.pipeline_mode<synchronous>, transform_indices = @transform_4, window_bounds = array<i64: 1, 32>}, {pipeline_mode = #tpu.pipeline_mode<synchronous>, transform_indices = @transform_5, window_bounds = array<i64: 32, 3>}, {pipeline_mode = #tpu.pipeline_mode<synchronous>, transform_indices = @transform_6, window_bounds = array<i64: 1, 3>}, {transform_indices = @transform_7, window_bounds = array<i64: 8, 3>}]} {
    %c0 = arith.constant 0 : index
    %c0_0 = arith.constant 0 : index
    %0 = vector.load %arg1[%c0, %c0_0] : memref<8x32xf32, #tpu.memory_space<vmem>>, vector<8x32xf32>
    %1 = arith.truncf %0 : vector<8x32xf32> to vector<8x32xbf16>
    %c0_1 = arith.constant 0 : index
    %c0_2 = arith.constant 0 : index
    %2 = vector.load %arg2[%c0_1, %c0_2] : memref<32x32xbf16, #tpu.memory_space<vmem>>, vector<32x32xbf16>
    %cst = arith.constant dense<0.000000e+00> : vector<8x32xf32>
    %3 = tpu.matmul %1, %2, %cst {dimension_numbers = #tpu.dot_dimension_numbers<[1], [0], [0], [1], [0, 0, 1, 1], [], []>} : vector<8x32xbf16>, vector<32x32xbf16>, vector<8x32xf32> -> vector<8x32xf32>
    %c0_3 = arith.constant 0 : index
    %c0_4 = arith.constant 0 : index
    %4 = vector.load %arg3[%c0_3, %c0_4] : memref<1x32xf32, #tpu.memory_space<vmem>>, vector<1x32xf32>
    %5 = vector.broadcast %4 : vector<1x32xf32> to vector<8x32xf32>
    %6 = arith.addf %3, %5 : vector<8x32xf32>
    %cst_5 = arith.constant 0.000000e+00 : f32
    %7 = vector.broadcast %cst_5 : f32 to vector<8x32xf32>
    %8 = arith.maximumf %6, %7 : vector<8x32xf32>
    %9 = vector.broadcast %cst_5 : f32 to vector<8x32xf32>
    %10 = arith.subf %6, %9 : vector<8x32xf32>
    %11 = arith.cmpf one, %10, %10 : vector<8x32xf32>
    %12 = vector.broadcast %cst_5 : f32 to vector<8x32xf32>
    %13 = arith.addf %6, %12 : vector<8x32xf32>
    %14 = math.absf %10 : vector<8x32xf32>
    %cst_6 = arith.constant 0.000000e+00 : f32
    %15 = vector.broadcast %cst_6 : f32 to vector<8x32xf32>
    %16 = arith.subf %15, %14 : vector<8x32xf32>
    %17 = math.exp %16 : vector<8x32xf32>
    %18 = math.log1p %17 : vector<8x32xf32>
    %19 = arith.addf %8, %18 : vector<8x32xf32>
    %20 = arith.select %11, %13, %19 : vector<8x32xi1>, vector<8x32xf32>
    %cst_7 = arith.constant 0.693147182 : f32
    %21 = vector.broadcast %cst_7 : f32 to vector<8x32xf32>
    %22 = arith.subf %20, %21 : vector<8x32xf32>
    %23 = arith.truncf %22 : vector<8x32xf32> to vector<8x32xbf16>
    %c0_8 = arith.constant 0 : index
    %c0_9 = arith.constant 0 : index
    %24 = vector.load %arg4[%c0_8, %c0_9] : memref<32x32xbf16, #tpu.memory_space<vmem>>, vector<32x32xbf16>
    %cst_10 = arith.constant dense<0.000000e+00> : vector<8x32xf32>
    %25 = tpu.matmul %23, %24, %cst_10 {dimension_numbers = #tpu.dot_dimension_numbers<[1], [0], [0], [1], [0, 0, 1, 1], [], []>} : vector<8x32xbf16>, vector<32x32xbf16>, vector<8x32xf32> -> vector<8x32xf32>
    %c0_11 = arith.constant 0 : index
    %c0_12 = arith.constant 0 : index
    %26 = vector.load %arg5[%c0_11, %c0_12] : memref<1x32xf32, #tpu.memory_space<vmem>>, vector<1x32xf32>
    %27 = vector.broadcast %26 : vector<1x32xf32> to vector<8x32xf32>
    %28 = arith.addf %25, %27 : vector<8x32xf32>
    %cst_13 = arith.constant 0.000000e+00 : f32
    %29 = vector.broadcast %cst_13 : f32 to vector<8x32xf32>
    %30 = arith.maximumf %28, %29 : vector<8x32xf32>
    %31 = vector.broadcast %cst_13 : f32 to vector<8x32xf32>
    %32 = arith.subf %28, %31 : vector<8x32xf32>
    %33 = arith.cmpf one, %32, %32 : vector<8x32xf32>
    %34 = vector.broadcast %cst_13 : f32 to vector<8x32xf32>
    %35 = arith.addf %28, %34 : vector<8x32xf32>
    %36 = math.absf %32 : vector<8x32xf32>
    %cst_14 = arith.constant 0.000000e+00 : f32
    %37 = vector.broadcast %cst_14 : f32 to vector<8x32xf32>
    %38 = arith.subf %37, %36 : vector<8x32xf32>
    %39 = math.exp %38 : vector<8x32xf32>
    %40 = math.log1p %39 : vector<8x32xf32>
    %41 = arith.addf %30, %40 : vector<8x32xf32>
    %42 = arith.select %33, %35, %41 : vector<8x32xi1>, vector<8x32xf32>
    %cst_15 = arith.constant 0.693147182 : f32
    %43 = vector.broadcast %cst_15 : f32 to vector<8x32xf32>
    %44 = arith.subf %42, %43 : vector<8x32xf32>
    %45 = arith.truncf %44 : vector<8x32xf32> to vector<8x32xbf16>
    %c0_16 = arith.constant 0 : index
    %c0_17 = arith.constant 0 : index
    %46 = vector.load %arg6[%c0_16, %c0_17] : memref<32x3xbf16, #tpu.memory_space<vmem>>, vector<32x3xbf16>
    %cst_18 = arith.constant dense<0.000000e+00> : vector<8x3xf32>
    %47 = tpu.matmul %45, %46, %cst_18 {dimension_numbers = #tpu.dot_dimension_numbers<[1], [0], [0], [1], [0, 0, 1, 1], [], []>} : vector<8x32xbf16>, vector<32x3xbf16>, vector<8x3xf32> -> vector<8x3xf32>
    %c0_19 = arith.constant 0 : index
    %c0_20 = arith.constant 0 : index
    %48 = vector.load %arg7[%c0_19, %c0_20] : memref<1x3xf32, #tpu.memory_space<vmem>>, vector<1x3xf32>
    %49 = vector.broadcast %48 : vector<1x3xf32> to vector<8x3xf32>
    %50 = arith.addf %47, %49 : vector<8x3xf32>
    %c0_21 = arith.constant 0 : index
    %c0_22 = arith.constant 0 : index
    %51 = vector.load %arg8[%c0_21, %c0_22] : memref<8x3xf32, #tpu.memory_space<vmem>>, vector<8x3xf32>
    tpu.vector_store %arg8[%c0_21, %c0_22], %50 {strides = array<i32>} : memref<8x3xf32, #tpu.memory_space<vmem>>, vector<8x3xf32>,
    return
  }
  func.func @transform_0(%arg0: i32) -> (i32, i32) {
    %c0_i32 = arith.constant 0 : i32
    %c0_i32_0 = arith.constant 0 : i32
    return %arg0, %c0_i32 : i32, i32
  }
  func.func @transform_1(%arg0: i32) -> (i32, i32) {
    %c0_i32 = arith.constant 0 : i32
    %c0_i32_0 = arith.constant 0 : i32
    %c0_i32_1 = arith.constant 0 : i32
    return %c0_i32, %c0_i32_0 : i32, i32
  }
  func.func @transform_2(%arg0: i32) -> (i32, i32) {
    %c0_i32 = arith.constant 0 : i32
    %c0_i32_0 = arith.constant 0 : i32
    %c0_i32_1 = arith.constant 0 : i32
    return %c0_i32, %c0_i32_0 : i32, i32
  }
  func.func @transform_3(%arg0: i32) -> (i32, i32) {
    %c0_i32 = arith.constant 0 : i32
    %c0_i32_0 = arith.constant 0 : i32
    %c0_i32_1 = arith.constant 0 : i32
    return %c0_i32, %c0_i32_0 : i32, i32
  }
  func.func @transform_4(%arg0: i32) -> (i32, i32) {
    %c0_i32 = arith.constant 0 : i32
    %c0_i32_0 = arith.constant 0 : i32
    %c0_i32_1 = arith.constant 0 : i32
    return %c0_i32, %c0_i32_0 : i32, i32
  }
  func.func @transform_5(%arg0: i32) -> (i32, i32) {
    %c0_i32 = arith.constant 0 : i32
    %c0_i32_0 = arith.constant 0 : i32
    %c0_i32_1 = arith.constant 0 : i32
    return %c0_i32, %c0_i32_0 : i32, i32
  }
  func.func @transform_6(%arg0: i32) -> (i32, i32) {
    %c0_i32 = arith.constant 0 : i32
    %c0_i32_0 = arith.constant 0 : i32
    %c0_i32_1 = arith.constant 0 : i32
    return %c0_i32, %c0_i32_0 : i32, i32
  }
  func.func @transform_7(%arg0: i32) -> (i32, i32) {
    %c0_i32 = arith.constant 0 : i32
    %c0_i32_0 = arith.constant 0 : i32
    return %arg0, %c0_i32 : i32, i32
  }
}

</mosaic_0001>

<bundles_post_ra>
// kernel: tpu_custom_call.1
= control target key start
LH: loop header
LB: loop body
LE: loop exit
PB: predicated region body
PF: predicated region fallthrough
CT: control target
= control target key end

     0   :  { %12 = vsyncpa [#allocation3], 0  ;;  %s922_s0 = inlined_call_operand.hbm [shape: f32[20,32], index: 0, kind: input, shape index: {}]   ;;  %s923_s1 = inlined_call_operand.vmem [shape: bf16[32,32], index: 1, kind: input, shape index: {}]   ;;  %s924_s2 = inlined_call_operand.vmem [shape: f32[1,32], index: 2, kind: input, shape index: {}]   ;;  %s925_s3 = inlined_call_operand.hbm [shape: bf16[32,32], index: 3, kind: input, shape index: {}]   ;;  %s926_s4 = inlined_call_operand.vmem [shape: f32[1,32], index: 4, kind: input, shape index: {}]   ;;  %s927_s5 = inlined_call_operand.vmem [shape: bf16[32,3], index: 5, kind: input, shape index: {}]   ;;  %s928_s6 = inlined_call_operand.vmem [shape: f32[1,3], index: 6, kind: input, shape index: {}]   ;;  %s929_s7 = inlined_call_operand.vmem [shape: f32[20,3], index: 7, kind: output, shape index: {}]  }
   0x1   :  { %14 = vsyncpa [#allocation3 + $0x1], 0 }
   0x2   :  { %15 = vsyncpa [#allocation5], 0  ;;  %s795_s24 = smov 0   ;;  %s797_s25 = smov 0  }
   0x3   :  { %s799_s26 = smov 0   ;;  %s801_s27 = smov 0  }
   0x4 LB: > { %s221_s30 = sshll.u32 %s925_s3, 4  ;;  %s817_s8 = sadd.s32 4294967295, %s750_s27   ;;  %s750_s27 = sphi %s801_s27, %s936_s27   ;;  %s746_s26 = sphi %s799_s26, %s935_s26   ;;  %s742_s25 = sphi %s797_s25, %s934_s25   ;;  %s738_s24 = sphi %s795_s24, %s933_s24   ;;  %s222_s30 = int_to_ptr.hbm [resolvable:$true] %s221_s30 }
   0x5   : > { %p543_p0 = scmp.ge.s32.totalorder %s750_s27, 1  ;;  %p42_p1 = scmp.eq.s32.totalorder %s817_s8, 0 }
   0x6   : > { %p204_p2 = scmp.lt.s32.totalorder %s750_s27, 4  ;;  %s752_s10 = smov [#allocation4]  }
   0x7   : > { %s223_s11 = sshll.u32 %s752_s10, 4  ;;  %s753_s12 = smov 64   ;;  %s224_s11 = int_to_ptr.vmem [resolvable:$true] %s223_s11 }
   0x8   : > { %p822_p3 = pnand %p543_p0, %p204_p2  ;;  %s754_s13 = smov 4  }
   0x9   : > { %s831_s14 = sadd.s32 1, %s750_s27   ;;  %s28_s16 = sadd.s32 1, %s746_s26 }
   0xa   : > { %p595_p4 = pneg %p822_p3  ;;  %s25_s15 = ssub.s32 %s750_s27, %s831_s14 }
   0xb   : > { %p26_p6 = scmp.eq.s32.totalorder %s25_s15, 0  ;;  %p35_p7 = scmp.ne.s32.totalorder %s746_s26, %s742_s25 }
   0xc   : > { %p596_p5 = pnand %p595_p4, %p42_p1  ;;  %p36_p8 = scmp.eq.s32.totalorder %s750_s27, 0 }
   0xd   : > { %p41_p9 = scmp.ne.s32.totalorder %s742_s25, %s738_s24  ;;  %p604_p12 = scmp.lt.s32.totalorder %s750_s27, 3 }
   0xe   : > { %598 = dma.hbm_to_vmem [thread:$0]  (!%p596_p5), %s222_s30, 256, %s224_s11, [#allocation5], %s753_s12, %s753_s12, %s754_s13  }
   0xf   : > { %s841_s17 = scalar_select %p26_p6, %s746_s26, %s28_s16  }
  0x10   : > { %p37_p10 = por %p36_p8, %p35_p7  ;;  %p845_p11 = por %p42_p1, %p41_p9 }
  0x11   : > { %s246_s19 = sand.u32 1, %s746_s26   ;;  %s547_s21 = sshll.u32 %s750_s27, 3 }
  0x12   : > { %s546_s20 = sshll.u32 %s246_s19, 3  ;;  %s254_s28 = scalar_lea.hbm %s922_s0, %s547_s21 }
  0x13   : > { %s250_s29 = scalar_lea.vmem [#allocation2], %s546_s20  ;;  %s256_s10 = sshll.u32 %s254_s28, 4  ;;  %s257_s10 = int_to_ptr.hbm [resolvable:$true] %s256_s10 }
  0x14   : > { %s258_s30 = sshll.u32 %s250_s29, 4  ;;  %p855_p13 = pnand %p604_p12, %p37_p10  ;;  %s259_s30 = int_to_ptr.vmem [resolvable:$true] %s258_s30 }
  0x15   : > { %s247_s11 = scalar_lea.sflag [#allocation3], %s246_s19  ;;  %s682_s12 = sshra.s32 %s257_s10, 4  ;;  %s683_s12 = int_to_ptr.hbm [resolvable:$true] %s682_s12 }
  0x16   : > { %s684_s13 = scalar_lea.hbm %s683_s12, 8  ;;  %p686_p2 = pneg %p855_p13 }
  0x17   : > { %p685_p0 = scmp.ne.s32.totalorder %s683_s12, %s684_s13  ;;  %s689_s16 = scalar_lea.hbm %s922_s0, 24 }
  0x18   : > { %p690_p6 = scmp.lt.s32.totalorder %s683_s12, %s922_s0  ;;  %p691_p7 = scmp.lt.s32.totalorder %s689_s16, %s684_s13 }
  0x19   : > { %p687_p4 = pnand %p686_p2, %p685_p0 }
  0x1a   : > { %p692_p8 = por %p691_p7, %p690_p6 }
  0x1b   : > { %p688_p5 = pneg %p687_p4 }
  0x1d   : > { %p693_p9 = pnand %p692_p8, %p688_p5 }
  0x1f   : > { %696 = shalt.err (!%p693_p9)
}
  0x20   : > { %602 = dma.hbm_to_vmem [thread:$0]  (!%p855_p13), %s257_s10, 128, %s259_s30, %s247_s11  }
  0x21   : > { %267 = sbr.rel (%p822_p3) target bundleno = 509 (0x1fd), region = 48  ;;  %s269_s19 = sand.u32 (!%p822_p3), 1, %s742_s25  }
  0x22   : > { %s549_s22 = sshll.u32 (!%p822_p3), %s269_s19, 3  ;;  %s270_s23 = scalar_lea.sflag (!%p822_p3), [#allocation3], %s269_s19 }
  0x23   : > { %s273_s28 = scalar_lea.vmem (!%p822_p3), [#allocation2], %s549_s22 }
  0x26   : > { %729 = dma.done.wait (%p845_p11), %s270_s23, 128  }
  0x27   : > { %731 = vsyncadd (%p845_p11), %s270_s23, 4294967168 }
  0x28   : > { %733 = dma.done.wait (%p42_p1), [#allocation5], 256  }
  0x29   : > { %735 = vsyncadd (%p42_p1), [#allocation5], 4294967040  ;;  %v584_v0 = vld [vmem:[%s923_s1 + $0x8] sm:$0xff]  ;;  %v583_v1 = vld [vmem:[%s923_s1] sm:$0xff]  ;;  %vm336_vm0 = vcmask 261120   ;;  %p309_p1 = scmp.lt.s32.totalorder %s817_s8, 2 }
  0x2a   : > { %346 = vmatpush.bf16.msra.mxu0 %v584_v0  ;;  %v314_v2 = vld [vmem:[%s273_s28] sm:$0xff]  ;;  %v586_v4 = vld [vmem:[#allocation4 + $0x8] sm:$0xff]  ;;  %v585_v5 = vld [vmem:[#allocation4] sm:$0xff]  ;;  %vm465_vm5 = vcmask 23552  }
  0x2b   : > { %v315_v3 = vpack.c.bf16 %v314_v2, %v314_v2  ;;  %402 = vmatpush.bf16.msra.mxu1 %v586_v4  ;;  %v641_v6 = vld [vmem:[%s924_s2] ss:$0 sm:$0xff]  ;;  %v588_v27 = vld [vmem:[%s927_s5 + $0x8] sm:$0xff]  ;;  %s938_s8 = smov (!%p309_p1, %s817_s8), 2 }
  0x2c   : > { %458 = vmatpush.bf16.msra.mxu2 %v588_v27  ;;  %v587_v28 = vld [vmem:[%s927_s5] sm:$0xff]  ;;  %s551_s20 = sshll.u32 %s938_s8, 3 }
  0x2d   : > { %v642_v29 = vld [vmem:[%s926_s4] ss:$0 sm:$0xff]  ;;  %s312_s28 = scalar_lea.vmem %s929_s7, %s551_s20 }
  0x2e   : > { %347 = vmatpush.bf16.msra.mxu0 %v583_v1  ;;  %v643_v50 = vld [vmem:[%s928_s6] ss:$0 sm:$0xff] }
  0x2f   : > { %403 = vmatpush.bf16.msra.mxu1 %v585_v5 }
  0x30   : > { %459 = vmatpush.bf16.msra.mxu2 %v587_v28 }
  0x31   : > { %560 = vmatmul.msk.bf16.vlgmr.msra.gmra.mxu0 %vm336_vm0, %v315_v3 }
  0xae   : > { %v349_v7 = vpop.f32.mrf.mxu0 }
  0xaf   : > { %v350_v8 = vadd.f32 %v641_v6, %v349_v7 }
  0xb1   : > { %v356_v9 = vand.u32 2147483647, %v350_v8  ;;  %v353_v21 = vmax.f32 %v350_v8, 0.0  ;;  %vm354_vm2 = vcmp.ne.f32.partialorder %v350_v8, %v350_v8 }
  0xb3   : > { %v357_v10 = vsub.f32 0.0, %v356_v9 }
  0xb5   : > { %v358_v11 = vmul.f32 1.442695, %v357_v10 }
  0xb6   : > { %v351_v12 = vpop.f32.mrf.mxu0 }
  0xb7   : > { %644 = vpow2.f32 %v358_v11 }
  0xbd   : > { %v645_v13 = vpop.eup %644 }
  0xbe   : > { %v360_v14 = vadd.f32 1.0, %v645_v13  ;;  %v363_v15 = vmul.f32 -0.5, %v645_v13  ;;  %v366_v17 = vand.u32 2147483647, %v645_v13 }
  0xc0   : > { %646 = vlog2.f32 %v360_v14  ;;  %v364_v16 = vadd.f32 1.0, %v363_v15  ;;  %vm367_vm1 = vcmp.lt.f32.partialorder %v366_v17, 0.0004427343 }
  0xc2   : > { %v365_v20 = vmul.f32 %v645_v13, %v364_v16 }
  0xc6   : > { %v647_v18 = vpop.eup %646 }
  0xc7   : > { %v362_v19 = vmul.f32 0.6931472, %v647_v18 }
  0xc9   : > { %v368_v22 = vsel %vm367_vm1, %v365_v20, %v362_v19 }
  0xca   : > { %v369_v23 = vadd.f32 %v368_v22, %v353_v21 }
  0xcc   : > { %v370_v24 = vsel %vm354_vm2, %v350_v8, %v369_v23 }
  0xcd   : > { %v561_v25 = vadd.f32 -0.6931472, %v370_v24 }
  0xcf   : > { %v372_v26 = vpack.c.bf16 %v561_v25, %v561_v25 }
  0xd1   : > { %570 = vmatmul.msk.bf16.vlgmr.msra.gmra.mxu1 %vm336_vm0, %v372_v26 }
 0x14e   : > { %v405_v30 = vpop.f32.mrf.mxu1 }
 0x14f   : > { %v406_v31 = vadd.f32 %v642_v29, %v405_v30 }
 0x151   : > { %v412_v32 = vand.u32 2147483647, %v406_v31  ;;  %v409_v44 = vmax.f32 %v406_v31, 0.0  ;;  %vm410_vm4 = vcmp.ne.f32.partialorder %v406_v31, %v406_v31 }
 0x153   : > { %v413_v33 = vsub.f32 0.0, %v412_v32 }
 0x155   : > { %v414_v34 = vmul.f32 1.442695, %v413_v33 }
 0x156   : > { %v407_v35 = vpop.f32.mrf.mxu1 }
 0x157   : > { %648 = vpow2.f32 %v414_v34 }
 0x15d   : > { %v649_v36 = vpop.eup %648 }
 0x15e   : > { %v416_v37 = vadd.f32 1.0, %v649_v36  ;;  %v419_v38 = vmul.f32 -0.5, %v649_v36  ;;  %v422_v40 = vand.u32 2147483647, %v649_v36 }
 0x160   : > { %650 = vlog2.f32 %v416_v37  ;;  %v420_v39 = vadd.f32 1.0, %v419_v38  ;;  %vm423_vm3 = vcmp.lt.f32.partialorder %v422_v40, 0.0004427343 }
 0x162   : > { %v421_v43 = vmul.f32 %v649_v36, %v420_v39 }
 0x166   : > { %v651_v41 = vpop.eup %650 }
 0x167   : > { %v418_v42 = vmul.f32 0.6931472, %v651_v41 }
 0x169   : > { %v424_v45 = vsel %vm423_vm3, %v421_v43, %v418_v42 }
 0x16a   : > { %v425_v46 = vadd.f32 %v424_v45, %v409_v44 }
 0x16c   : > { %v426_v47 = vsel %vm410_vm4, %v406_v31, %v425_v46 }
 0x16d   : > { %v571_v48 = vadd.f32 -0.6931472, %v426_v47 }
 0x16f   : > { %v428_v49 = vpack.c.bf16 %v571_v48, %v571_v48 }
 0x171   : > { %580 = vmatmul.msk.bf16.vlgmr.msra.gmra.mxu2 %vm336_vm0, %v428_v49 }
 0x1f4   : > { %v461_v51 = vpop.f32.mrf.mxu2 }
 0x1f5   : > { %v462_v52 = vadd.f32 %v643_v50, %v461_v51 }
 0x1f7   : > { %466 = vst.msk [vmem:[%s312_s28] sm:$0xff] %vm465_vm5, %v462_v52 }
 0x1fc   : > { %v463_v53 = vpop.f32.mrf.mxu2 }
 0x1fd PF: > { %p18_p3 = scmp.ge.s32.totalorder %s831_s14, 5   ;;  %s933_s24 = smov %s742_s25 }
 0x1fe   : > { %s934_s25 = smov %s746_s26  ;;  %s935_s26 = smov %s841_s17 }
 0x1ff   : > { %s936_s27 = smov %s831_s14  ;;  %20 = sbr.rel (!%p18_p3) target bundleno = 4 (0x4), region = 92 }
 0x204   :  { %486 = vsyncpa [#allocation3], 1 }
 0x205   :  { %488 = vsyncpa [#allocation3 + $0x1], 1 }
 0x206   :  { %489 = vsyncpa [#allocation5], 1 }

</bundles_post_ra>
